<compile_context>
chip_gen: v6e
topology: v6e:2x2x1
jax: 0.10.0
libtpu: 0.0.40
codegen_flags: <defaults>
</compile_context>

<pallas_src>
import numpy as np
import jax
import jax.numpy as jnp
from jax.experimental import pallas as pl
from jax.experimental.pallas import tpu as pltpu


def _round_up(x, m):
    return ((x + m - 1) // m) * m


def conv1d_upsampling(x_ncl, params, *, rows_per_step=256):
    """x_ncl: (N, Cin, L) float32 (PyTorch NCL). Returns (N, Cout, 4*L+3) float32."""
    w1, b1, w2, b2 = params["w1"], params["b1"], params["w2"], params["b2"]
    N, Cin, L = x_ncl.shape
    Cout = w1.shape[1]
    assert w1.shape == (Cin, Cout, 3) and w2.shape == (Cout, Cout, 3)
    L1 = 2 * L + 1
    L2 = 2 * L1 + 1                      # = 4*L + 3

    # Padded sizes.
    Lp = _round_up(L + 1, 8)             # >= L+1 so h1[2L] exists; trailing rows are zero
    C1P = _round_up(Cout, 128)           # layer-1 channels padded -> 128-aligned tap slices
    CP2 = _round_up(Cout, 32)            # per-phase channel pad so 4*CP2 is a multiple of 128
    assert (4 * CP2) % 128 == 0

    # Batch tiling: pack several batch elements into one M-tile per grid step.
    TN = max(1, min(N, max(1, rows_per_step // Lp)))
    Np = _round_up(N, TN)
    TM = TN * Lp
    grid = (Np // TN,)

    f32 = jnp.float32

    # ---- input: NCL -> zero-padded NLC -> flattened (Np*Lp, Cin) rows ----
    x = jnp.transpose(x_ncl, (0, 2, 1)).astype(f32)                 # (N, L, Cin)
    x = jnp.pad(x, ((0, Np - N), (0, Lp - L), (0, 0)))              # (Np, Lp, Cin)
    x2d = x.reshape(Np * Lp, Cin)

    # ---- fused layer-1 weight: [w1_0 | w1_1 | w1_2], each tap padded to C1P lanes ----
    W1f = jnp.zeros((Cin, 3 * C1P), f32)
    for k in range(3):
        W1f = W1f.at[:, k * C1P:k * C1P + Cout].set(w1[:, :, k].astype(f32))
    b1p = jnp.zeros((1, C1P), f32).at[0, :Cout].set(b1.astype(f32))

    # ---- fused layer-2 weight: rows = [h_even | h_odd_shift | h_odd] channel blocks,
    #      cols = 4 output phases; out[4q+r] = phase r at position q:
    #        r=0: h_even[q]@w2_0 + h_odd[q-1]@w2_2
    #        r=1: h_even[q]@w2_1
    #        r=2: h_even[q]@w2_2 + h_odd[q]@w2_0
    #        r=3: h_odd[q]@w2_1
    W2f = jnp.zeros((3 * C1P, 4 * CP2), f32)
    E, S, O = 0, C1P, 2 * C1P            # row offsets of h_even / h_odd_shift / h_odd

    def _put(Wf, row0, r, wk):
        return Wf.at[row0:row0 + Cout, r * CP2:r * CP2 + Cout].set(wk.astype(f32))

    W2f = _put(W2f, E, 0, w2[:, :, 0])
    W2f = _put(W2f, E, 1, w2[:, :, 1])
    W2f = _put(W2f, E, 2, w2[:, :, 2])
    W2f = _put(W2f, S, 0, w2[:, :, 2])
    W2f = _put(W2f, O, 2, w2[:, :, 0])
    W2f = _put(W2f, O, 3, w2[:, :, 1])
    b2c = jnp.zeros((1, 4 * CP2), f32)
    for r in range(4):
        b2c = b2c.at[0, r * CP2:r * CP2 + Cout].set(b2.astype(f32))

    def kernel(x_ref, w1_ref, b1_ref, w2_ref, b2_ref, o_ref):
        xb = x_ref[...]                                              # (TM, Cin)
        # Layer 1: one fused matmul for all three taps.
        y = jnp.dot(xb, w1_ref[...], preferred_element_type=f32)     # (TM, 3*C1P)
        y0 = y[:, 0 * C1P:1 * C1P]                                   # x[q] @ w1_0
        y1 = y[:, 1 * C1P:2 * C1P]                                   # x[q] @ w1_1
        y2 = y[:, 2 * C1P:3 * C1P]                                   # x[q] @ w1_2
        zrow = jnp.zeros((1, C1P), f32)
        y2s = jnp.concatenate([zrow, y2[:TM - 1, :]], axis=0)        # y2s[q] = y2[q-1]
        b1v = b1_ref[...]
        h_even = jnp.maximum(y0 + y2s + b1v, 0.0)                    # = h1[2q]
        h_odd = jnp.maximum(y1 + b1v, 0.0)                           # = h1[2q+1]
        # Zero the phantom padded rows of h_odd (position q >= L inside each example);
        # otherwise relu(b1) would leak into valid outputs via phases 0 and 2.
        # (h_even needs no mask: its phantom rows only reach output rows >= 4L+4,
        #  which are sliced off in the wrapper.)
        q = jax.lax.broadcasted_iota(jnp.int32, (TN, Lp, C1P), 1).reshape(TM, C1P)
        h_odd = jnp.where(q < L, h_odd, 0.0)
        h_odd_s = jnp.concatenate([zrow, h_odd[:TM - 1, :]], axis=0)  # h_odd[q-1]
        # Layer 2: one fused matmul producing all 4 output phases on the lane axis.
        hcat = jnp.concatenate([h_even, h_odd_s, h_odd], axis=1)     # (TM, 3*C1P)
        out = jnp.dot(hcat, w2_ref[...], preferred_element_type=f32) + b2_ref[...]
        o_ref[...] = jnp.maximum(out, 0.0).astype(o_ref.dtype)       # (TM, 4*CP2), lane-dense

    out2d = pl.pallas_call(
        kernel,
        out_shape=jax.ShapeDtypeStruct((Np * Lp, 4 * CP2), f32),
        grid=grid,
        in_specs=[
            pl.BlockSpec((TM, Cin), lambda i: (i, 0)),
            pl.BlockSpec((Cin, 3 * C1P), lambda i: (0, 0)),
            pl.BlockSpec((1, C1P), lambda i: (0, 0)),
            pl.BlockSpec((3 * C1P, 4 * CP2), lambda i: (0, 0)),
            pl.BlockSpec((1, 4 * CP2), lambda i: (0, 0)),
        ],
        out_specs=pl.BlockSpec((TM, 4 * CP2), lambda i: (i, 0)),
        compiler_params=pltpu.CompilerParams(dimension_semantics=("parallel",)),
    )(x2d, W1f, b1p, W2f, b2c)

    # (Np*Lp, 4*CP2) -> de-phase, un-pad, back to NCL (all plain XLA, outside the kernel).
    out = out2d.reshape(Np, Lp, 4, CP2)[:N, :, :, :Cout]             # (N, Lp, 4, Cout)
    out = out.reshape(N, 4 * Lp, Cout)[:, :L2, :]                    # (N, 4L+3, Cout)
    return jnp.transpose(out, (0, 2, 1))                             # (N, Cout, 4L+3)


def _ref_forward(x, w1, b1, w2, b2):
    """Pure-numpy reference of the PyTorch module's forward."""
    def deconv_relu(x, w, b):
        N, Cin, L = x.shape
        Cout = w.shape[1]
        Lout = 2 * (L - 1) + 3
        out = np.zeros((N, Cout, Lout), np.float32)
        for k in range(3):
            for t in range(L):
                out[:, :, 2 * t + k] += x[:, :, t] @ w[:, :, k]
        out += b[None, :, None]
        return np.maximum(out, 0.0)

    h = deconv_relu(np.asarray(x), np.asarray(w1), np.asarray(b1))
    return deconv_relu(h, np.asarray(w2), np.asarray(b2))


if __name__ == "__main__":
    N, Cin, Cout, L = 2, 4, 8, 16   # output length = 4*L + 3 = 67
    key = jax.random.PRNGKey(0)
    kx, k1, kb1, k2, kb2 = jax.random.split(key, 5)

    x = jax.random.normal(kx, (N, Cin, L), jnp.float32)
    # PyTorch ConvTranspose1d weight shape = (Cin, Cout, K)
    w1 = 0.3 * jax.random.normal(k1, (Cin, Cout, 3), jnp.float32)
    b1 = 0.1 * jax.random.normal(kb1, (Cout,), jnp.float32)
    w2 = 0.3 * jax.random.normal(k2, (Cout, Cout, 3), jnp.float32)
    b2 = 0.1 * jax.random.normal(kb2, (Cout,), jnp.float32)
    params = dict(w1=w1, b1=b1, w2=w2, b2=b2)

    y = jax.block_until_ready(conv1d_upsampling(x, params))

    y_ref = _ref_forward(x, w1, b1, w2, b2)
    assert y.shape == y_ref.shape, (y.shape, y_ref.shape)
    np.testing.assert_allclose(np.asarray(y), y_ref, rtol=2e-2, atol=2e-2)
    print("KERNEL_OK")
</pallas_src>

<mosaic_0001>
module attributes {stable_mosaic.version = 11 : i64} {
  func.func @kernel(%arg0: i32, %arg1: memref<48x4xf32, #tpu.memory_space<vmem>>, %arg2: memref<4x384xf32, #tpu.memory_space<vmem>>, %arg3: memref<1x128xf32, #tpu.memory_space<vmem>>, %arg4: memref<384x128xf32, #tpu.memory_space<vmem>>, %arg5: memref<1x128xf32, #tpu.memory_space<vmem>>, %arg6: memref<48x128xf32, #tpu.memory_space<vmem>>) attributes {dimension_semantics = [#tpu.dimension_semantics<parallel>], iteration_bounds = array<i64: 1>, scalar_prefetch = 0 : i64, scratch_operands = 0 : i64, tpu.core_type = #tpu.core_type<tc>, window_params = [{transform_indices = @transform_0, window_bounds = array<i64: 48, 4>}, {pipeline_mode = #tpu.pipeline_mode<synchronous>, transform_indices = @transform_1, window_bounds = array<i64: 4, 384>}, {pipeline_mode = #tpu.pipeline_mode<synchronous>, transform_indices = @transform_2, window_bounds = array<i64: 1, 128>}, {pipeline_mode = #tpu.pipeline_mode<synchronous>, transform_indices = @transform_3, window_bounds = array<i64: 384, 128>}, {pipeline_mode = #tpu.pipeline_mode<synchronous>, transform_indices = @transform_4, window_bounds = array<i64: 1, 128>}, {transform_indices = @transform_5, window_bounds = array<i64: 48, 128>}]} {
    %c0 = arith.constant 0 : index
    %c0_0 = arith.constant 0 : index
    %0 = vector.load %arg1[%c0, %c0_0] : memref<48x4xf32, #tpu.memory_space<vmem>>, vector<48x4xf32>
    %c0_1 = arith.constant 0 : index
    %c0_2 = arith.constant 0 : index
    %1 = vector.load %arg2[%c0_1, %c0_2] : memref<4x384xf32, #tpu.memory_space<vmem>>, vector<4x384xf32>
    %cst = arith.constant dense<0.000000e+00> : vector<48x384xf32>
    %2 = tpu.matmul %0, %1, %cst {dimension_numbers = #tpu.dot_dimension_numbers<[1], [0], [0], [1], [0, 0, 1, 1], [], []>} : vector<48x4xf32>, vector<4x384xf32>, vector<48x384xf32> -> vector<48x384xf32>
    %3 = vector.extract_strided_slice %2 {offsets = [0, 0], sizes = [48, 128], strides = [1, 1]} : vector<48x384xf32> to vector<48x128xf32>
    %4 = vector.extract_strided_slice %2 {offsets = [0, 128], sizes = [48, 128], strides = [1, 1]} : vector<48x384xf32> to vector<48x128xf32>
    %5 = vector.extract_strided_slice %2 {offsets = [0, 256], sizes = [48, 128], strides = [1, 1]} : vector<48x384xf32> to vector<48x128xf32>
    %cst_3 = arith.constant 0.000000e+00 : f32
    %6 = vector.broadcast %cst_3 : f32 to vector<1x128xf32>
    %7 = vector.extract_strided_slice %5 {offsets = [0, 0], sizes = [47, 128], strides = [1, 1]} : vector<48x128xf32> to vector<47x128xf32>
    %8 = tpu.concatenate %6, %7 in 0 : vector<1x128xf32>, vector<47x128xf32> -> vector<48x128xf32>
    %c0_4 = arith.constant 0 : index
    %c0_5 = arith.constant 0 : index
    %9 = vector.load %arg3[%c0_4, %c0_5] : memref<1x128xf32, #tpu.memory_space<vmem>>, vector<1x128xf32>
    %10 = arith.addf %3, %8 : vector<48x128xf32>
    %11 = vector.broadcast %9 : vector<1x128xf32> to vector<48x128xf32>
    %12 = arith.addf %10, %11 : vector<48x128xf32>
    %cst_6 = arith.constant 0.000000e+00 : f32
    %13 = vector.broadcast %cst_6 : f32 to vector<48x128xf32>
    %14 = arith.maximumf %12, %13 : vector<48x128xf32>
    %15 = vector.broadcast %9 : vector<1x128xf32> to vector<48x128xf32>
    %16 = arith.addf %4, %15 : vector<48x128xf32>
    %cst_7 = arith.constant 0.000000e+00 : f32
    %17 = vector.broadcast %cst_7 : f32 to vector<48x128xf32>
    %18 = arith.maximumf %16, %17 : vector<48x128xf32>
    %19 = tpu.iota {dimensions = array<i32: 1>} : vector<2x24x128xi32>
    %20 = vector.shape_cast %19 : vector<2x24x128xi32> to vector<48x128xi32>
    %c16_i32 = arith.constant 16 : i32
    %21 = vector.broadcast %c16_i32 : i32 to vector<48x128xi32>
    %22 = arith.cmpi slt, %20, %21 : vector<48x128xi32>
    %cst_8 = arith.constant 0.000000e+00 : f32
    %23 = vector.broadcast %cst_8 : f32 to vector<48x128xf32>
    %24 = arith.select %22, %18, %23 : vector<48x128xi1>, vector<48x128xf32>
    %25 = vector.extract_strided_slice %24 {offsets = [0, 0], sizes = [47, 128], strides = [1, 1]} : vector<48x128xf32> to vector<47x128xf32>
    %26 = tpu.concatenate %6, %25 in 0 : vector<1x128xf32>, vector<47x128xf32> -> vector<48x128xf32>
    %27 = tpu.concatenate %14, %26, %24 in 1 : vector<48x128xf32>, vector<48x128xf32>, vector<48x128xf32> -> vector<48x384xf32>
    %c0_9 = arith.constant 0 : index
    %c0_10 = arith.constant 0 : index
    %28 = vector.load %arg4[%c0_9, %c0_10] : memref<384x128xf32, #tpu.memory_space<vmem>>, vector<384x128xf32>
    %cst_11 = arith.constant dense<0.000000e+00> : vector<48x128xf32>
    %29 = tpu.matmul %27, %28, %cst_11 {dimension_numbers = #tpu.dot_dimension_numbers<[1], [0], [0], [1], [0, 0, 1, 1], [], []>} : vector<48x384xf32>, vector<384x128xf32>, vector<48x128xf32> -> vector<48x128xf32>
    %c0_12 = arith.constant 0 : index
    %c0_13 = arith.constant 0 : index
    %30 = vector.load %arg5[%c0_12, %c0_13] : memref<1x128xf32, #tpu.memory_space<vmem>>, vector<1x128xf32>
    %31 = vector.broadcast %30 : vector<1x128xf32> to vector<48x128xf32>
    %32 = arith.addf %29, %31 : vector<48x128xf32>
    %cst_14 = arith.constant 0.000000e+00 : f32
    %33 = vector.broadcast %cst_14 : f32 to vector<48x128xf32>
    %34 = arith.maximumf %32, %33 : vector<48x128xf32>
    %c0_15 = arith.constant 0 : index
    %c0_16 = arith.constant 0 : index
    %35 = vector.load %arg6[%c0_15, %c0_16] : memref<48x128xf32, #tpu.memory_space<vmem>>, vector<48x128xf32>
    tpu.vector_store %arg6[%c0_15, %c0_16], %34 {strides = array<i32>} : memref<48x128xf32, #tpu.memory_space<vmem>>, vector<48x128xf32>,
    return
  }
  func.func @transform_0(%arg0: i32) -> (i32, i32) {
    %c0_i32 = arith.constant 0 : i32
    %c0_i32_0 = arith.constant 0 : i32
    return %arg0, %c0_i32 : i32, i32
  }
  func.func @transform_1(%arg0: i32) -> (i32, i32) {
    %c0_i32 = arith.constant 0 : i32
    %c0_i32_0 = arith.constant 0 : i32
    %c0_i32_1 = arith.constant 0 : i32
    return %c0_i32, %c0_i32_0 : i32, i32
  }
  func.func @transform_2(%arg0: i32) -> (i32, i32) {
    %c0_i32 = arith.constant 0 : i32
    %c0_i32_0 = arith.constant 0 : i32
    %c0_i32_1 = arith.constant 0 : i32
    return %c0_i32, %c0_i32_0 : i32, i32
  }
  func.func @transform_3(%arg0: i32) -> (i32, i32) {
    %c0_i32 = arith.constant 0 : i32
    %c0_i32_0 = arith.constant 0 : i32
    %c0_i32_1 = arith.constant 0 : i32
    return %c0_i32, %c0_i32_0 : i32, i32
  }
  func.func @transform_4(%arg0: i32) -> (i32, i32) {
    %c0_i32 = arith.constant 0 : i32
    %c0_i32_0 = arith.constant 0 : i32
    %c0_i32_1 = arith.constant 0 : i32
    return %c0_i32, %c0_i32_0 : i32, i32
  }
  func.func @transform_5(%arg0: i32) -> (i32, i32) {
    %c0_i32 = arith.constant 0 : i32
    %c0_i32_0 = arith.constant 0 : i32
    return %arg0, %c0_i32 : i32, i32
  }
}

</mosaic_0001>

<bundles_post_ra>
// kernel: tpu_custom_call.1
= control target key start
LH: loop header
LB: loop body
LE: loop exit
PB: predicated region body
PF: predicated region fallthrough
CT: control target
= control target key end

     0   :  { %10 = vsyncpa [#allocation3], 0  ;;  %s963_s0 = inlined_call_operand.vmem [shape: f32[48,4], index: 0, kind: input, shape index: {}]   ;;  %s964_s1 = inlined_call_operand.vmem [shape: f32[4,384], index: 1, kind: input, shape index: {}]   ;;  %s965_s2 = inlined_call_operand.vmem [shape: f32[1,128], index: 2, kind: input, shape index: {}]   ;;  %s966_s3 = inlined_call_operand.hbm [shape: f32[384,128], index: 3, kind: input, shape index: {}]   ;;  %s967_s4 = inlined_call_operand.vmem [shape: f32[1,128], index: 4, kind: input, shape index: {}]   ;;  %s968_s5 = inlined_call_operand.hbm [shape: f32[48,128], index: 5, kind: output, shape index: {}]  }
   0x1   :  { %11 = vsyncpa [#allocation4], 0  ;;  %s841_s18 = smov [#allocation2]  }
   0x2   :  { %s23_s19 = sshll.u32 %s841_s18, 4  ;;  %s24_s19 = int_to_ptr.vmem [resolvable:$true] %s23_s19 }
   0x3   :  { %s805_s20 = scalar_lea.vmem %s24_s19, 6144  ;;  %p810_p1 = scmp.lt.s32.totalorder %s24_s19, %s24_s19 }
   0x4   :  { %p806_p0 = scmp.ne.s32.totalorder %s24_s19, %s805_s20  ;;  %p811_p2 = scmp.lt.s32.totalorder %s805_s20, %s805_s20 }
   0x6   :  { %p812_p3 = por %p811_p2, %p810_p1 }
   0x8   :  { %p813_p4 = pnand %p812_p3, %p806_p0 }
   0xa   :  { %816 = shalt.err (!%p813_p4)
}
   0xb   :  { %s842_s21 = smov 128   ;;  %s843_s22 = smov 8  }
   0xc   :  { %29 = dma.hbm_to_vmem [thread:$0]  %s966_s3, 6144, %s24_s19, [#allocation3], %s842_s21, %s842_s21, %s843_s22  }
   0xd   :  { %837 = dma.done.wait [#allocation3], 6144  }
   0xe   :  { %838 = vsyncadd [#allocation3], 4294961152  ;;  %v844_v0 = vmov 0.0   ;;  %vm65_vm0 = vcmask 1043456   ;;  %vm46_vm1 = vcmask 31744   ;;  %v35_v2 = vld [vmem:[%s963_s0] sm:$0xff] }
   0xf   :  { %136 = vmatprep.mubr.f32.mxu0 %v844_v0  ;;  %v42_v1 = vld [vmem:[%s964_s1 + $0x8] sm:$0xf]  ;;  %v41_v3 = vld [vmem:[%s964_s1] sm:$0xff]  ;;  %741 = vmatprep.mubr.msk.f32.mxu1 %vm46_vm1, %v35_v2  ;;  %v37_v6 = vld [vmem:[%s963_s0 + $0x10] sm:$0xff]  ;;  %vm274_vm2 = vcmask 1040384  }
  0x10   :  { %739 = vmatprep.subr.msk.mxu1 %vm65_vm0, %v42_v1  ;;  %v45_v4 = vcombine.high %v41_v3, %v41_v3  ;;  %v36_v5 = vld [vmem:[%s963_s0 + $0x8] sm:$0xff]  ;;  %v398_v7 = vld [vmem:[#allocation2 + $0xf8] sm:$0xff]  ;;  %v39_v11 = vld [vmem:[%s963_s0 + $0x20] sm:$0xff] }
  0x11   :  { %740 = vmatpush3.msk.msra.mxu1 %vm65_vm0, %v42_v1  ;;  %v382_v8 = vld [vmem:[#allocation2 + $0x78] sm:$0xff]  ;;  %v397_v12 = vld [vmem:[#allocation2 + $0xf0] sm:$0xff]  ;;  %v40_v14 = vld [vmem:[%s963_s0 + $0x28] sm:$0xff] }
  0x12   :  { %641 = vmatprep.subr.msk.mxu0 %vm65_vm0, %v45_v4  ;;  %742 = vmatmul.mubr.msk.f32.vlgmr.msra.gmra.mxu1 %vm46_vm1, %v36_v5  ;;  %v38_v9 = vld [vmem:[%s963_s0 + $0x18] sm:$0xff]  ;;  %v381_v13 = vld [vmem:[#allocation2 + $0x70] sm:$0xff]  ;;  %v396_v16 = vld [vmem:[#allocation2 + $0xe8] sm:$0xff] }
  0x13   :  { %642 = vmatpush1.msk.msra.mxu0 %vm65_vm0, %v41_v3  ;;  %744 = vmatprep.mubr.msk.f32.mxu1 %vm46_vm1, %v37_v6  ;;  %v414_v10 = vld [vmem:[#allocation2 + $0x178] sm:$0xff]  ;;  %v413_v15 = vld [vmem:[#allocation2 + $0x170] sm:$0xff]  ;;  %v412_v17 = vld [vmem:[#allocation2 + $0x168] sm:$0xff] }
  0x14   :  { %643 = vmatmul.mubr.msk.f32.vlgmr.msra.gmra.mxu0 %vm46_vm1, %v35_v2  ;;  %667 = vmatprep.subr.mxu0 %v398_v7  ;;  %v380_v18 = vld [vmem:[#allocation2 + $0x68] sm:$0xff]  ;;  %v395_v19 = vld [vmem:[#allocation2 + $0xe0] sm:$0xff]  ;;  %v394_v22 = vld [vmem:[#allocation2 + $0xd8] sm:$0xff] }
  0x15   :  { %142 = vmatprep.mubr.f32.mxu0 %v844_v0  ;;  %668 = vmatpush3.msra.mxu0 %v382_v8  ;;  %v379_v20 = vld [vmem:[#allocation2 + $0x60] sm:$0xff]  ;;  %v378_v23 = vld [vmem:[#allocation2 + $0x58] sm:$0xff]  ;;  %v393_v25 = vld [vmem:[#allocation2 + $0xd0] sm:$0xff] }
  0x16   :  { %745 = vmatmul.mubr.msk.f32.gmra.mxu1 %vm46_vm1, %v38_v9  ;;  %750 = vmatprep.subr.mxu1 %v414_v10  ;;  %v411_v21 = vld [vmem:[#allocation2 + $0x160] sm:$0xff]  ;;  %v410_v24 = vld [vmem:[#allocation2 + $0x158] sm:$0xff]  ;;  %v409_v26 = vld [vmem:[#allocation2 + $0x150] sm:$0xff] }
  0x17   :  { %747 = vmatprep.mubr.msk.f32.mxu1 %vm46_vm1, %v39_v11  ;;  %669 = vmatprep.subr.mxu0 %v397_v12  ;;  %v377_v27 = vld [vmem:[#allocation2 + $0x50] sm:$0xff]  ;;  %v392_v28 = vld [vmem:[#allocation2 + $0xc8] sm:$0xff]  ;;  %v391_v31 = vld [vmem:[#allocation2 + $0xc0] sm:$0xff] }
  0x18   :  { %644 = vmatmul.mubr.msk.f32.gmra.mxu0 %vm46_vm1, %v36_v5  ;;  %751 = vmatpush3.msra.mxu1 %v414_v10  ;;  %v376_v29 = vld [vmem:[#allocation2 + $0x48] sm:$0xff]  ;;  %v375_v32 = vld [vmem:[#allocation2 + $0x40] sm:$0xff]  ;;  %v390_v34 = vld [vmem:[#allocation2 + $0xb8] sm:$0xff] }
  0x19   :  { %148 = vmatprep.mubr.f32.mxu0 %v844_v0  ;;  %670 = vmatpush3.msra.mxu0 %v381_v13  ;;  %v408_v30 = vld [vmem:[#allocation2 + $0x148] sm:$0xff]  ;;  %v407_v33 = vld [vmem:[#allocation2 + $0x140] sm:$0xff]  ;;  %v374_v35 = vld [vmem:[#allocation2 + $0x38] sm:$0xff] }
  0x1a   :  { %748 = vmatmul.mubr.msk.f32.gmra.mxu1 %vm46_vm1, %v40_v14  ;;  %752 = vmatprep.subr.mxu1 %v413_v15  ;;  %v406_v36 = vld [vmem:[#allocation2 + $0x138] sm:$0xff]  ;;  %v389_v37 = vld [vmem:[#allocation2 + $0xb0] sm:$0xff]  ;;  %v388_v40 = vld [vmem:[#allocation2 + $0xa8] sm:$0xff] }
  0x1b   :  { %671 = vmatprep.subr.mxu0 %v396_v16  ;;  %753 = vmatpush3.msra.mxu1 %v413_v15  ;;  %v373_v38 = vld [vmem:[#allocation2 + $0x30] sm:$0xff]  ;;  %v372_v41 = vld [vmem:[#allocation2 + $0x28] sm:$0xff]  ;;  %v387_v43 = vld [vmem:[#allocation2 + $0xa0] sm:$0xff] }
  0x1c   :  { %645 = vmatmul.mubr.msk.f32.gmra.mxu0 %vm46_vm1, %v37_v6  ;;  %754 = vmatprep.subr.mxu1 %v412_v17  ;;  %v405_v39 = vld [vmem:[#allocation2 + $0x130] sm:$0xff]  ;;  %v404_v42 = vld [vmem:[#allocation2 + $0x128] sm:$0xff]  ;;  %v371_v44 = vld [vmem:[#allocation2 + $0x20] sm:$0xff] }
  0x1d   :  { %154 = vmatprep.mubr.f32.mxu0 %v844_v0  ;;  %672 = vmatpush3.msra.mxu0 %v380_v18  ;;  %v403_v45 = vld [vmem:[#allocation2 + $0x120] sm:$0xff]  ;;  %v386_v46 = vld [vmem:[#allocation2 + $0x98] sm:$0xff]  ;;  %v385_v49 = vld [vmem:[#allocation2 + $0x90] sm:$0xff] }
  0x1e   :  { %673 = vmatprep.subr.mxu0 %v395_v19  ;;  %755 = vmatpush3.msra.mxu1 %v412_v17  ;;  %v370_v47 = vld [vmem:[#allocation2 + $0x18] sm:$0xff]  ;;  %v369_v50 = vld [vmem:[#allocation2 + $0x10] sm:$0xff]  ;;  %v384_v52 = vld [vmem:[#allocation2 + $0x88] sm:$0xff] }
  0x1f   :  { %674 = vmatpush3.msra.mxu0 %v379_v20  ;;  %756 = vmatprep.subr.mxu1 %v411_v21  ;;  %v402_v48 = vld [vmem:[#allocation2 + $0x118] sm:$0xff]  ;;  %v401_v51 = vld [vmem:[#allocation2 + $0x110] sm:$0xff]  ;;  %v368_v53 = vld [vmem:[#allocation2 + $0x8] sm:$0xff] }
  0x20   :  { %646 = vmatmul.mubr.msk.f32.gmra.mxu0 %vm46_vm1, %v38_v9  ;;  %675 = vmatprep.subr.mxu0 %v394_v22  ;;  %v400_v54 = vld [vmem:[#allocation2 + $0x108] sm:$0xff]  ;;  %v383_v55 = vld [vmem:[#allocation2 + $0x80] sm:$0xff]  ;;  %vm658_vm3 = vmneg %vm274_vm2 }
  0x21   :  { %160 = vmatprep.mubr.f32.mxu0 %v844_v0  ;;  %757 = vmatpush3.msra.mxu1 %v411_v21  ;;  %v367_v56 = vld [vmem:[#allocation2] sm:$0xff] }
  0x22   :  { %676 = vmatpush3.msra.mxu0 %v378_v23  ;;  %758 = vmatprep.subr.mxu1 %v410_v24  ;;  %v399_v57 = vld [vmem:[#allocation2 + $0x100] sm:$0xff] }
  0x23   :  { %677 = vmatprep.subr.mxu0 %v393_v25  ;;  %759 = vmatpush3.msra.mxu1 %v410_v24  ;;  %v927_v62 = vld [vmem:[%s965_s2] ss:$0 sm:$0xff] }
  0x24   :  { %647 = vmatmul.mubr.msk.f32.gmra.mxu0 %vm46_vm1, %v39_v11  ;;  %760 = vmatprep.subr.mxu1 %v409_v26 }
  0x25   :  { %166 = vmatprep.mubr.f32.mxu0 %v844_v0  ;;  %678 = vmatpush3.msra.mxu0 %v377_v27  ;;  %v352_v27 = vrot.slane %v844_v0, 7 }
  0x26   :  { %679 = vmatprep.subr.mxu0 %v392_v28  ;;  %761 = vmatpush3.msra.mxu1 %v409_v26 }
  0x27   :  { %680 = vmatpush3.msra.mxu0 %v376_v29  ;;  %762 = vmatprep.subr.mxu1 %v408_v30 }
  0x28   :  { %648 = vmatmul.mubr.msk.f32.gmra.mxu0 %vm46_vm1, %v40_v14  ;;  %681 = vmatprep.subr.mxu0 %v391_v31 }
  0x29   :  { %763 = vmatpush3.msra.mxu1 %v408_v30  ;;  %682 = vmatpush3.msra.mxu0 %v375_v32 }
  0x2a   :  { %764 = vmatprep.subr.mxu1 %v407_v33  ;;  %683 = vmatprep.subr.mxu0 %v390_v34 }
  0x2b   :  { %765 = vmatpush3.msra.mxu1 %v407_v33  ;;  %684 = vmatpush3.msra.mxu0 %v374_v35 }
  0x2c   :  { %766 = vmatprep.subr.mxu1 %v406_v36  ;;  %685 = vmatprep.subr.mxu0 %v389_v37 }
  0x2d   :  { %767 = vmatpush3.msra.mxu1 %v406_v36  ;;  %686 = vmatpush3.msra.mxu0 %v373_v38 }
  0x2e   :  { %768 = vmatprep.subr.mxu1 %v405_v39  ;;  %687 = vmatprep.subr.mxu0 %v388_v40 }
  0x2f   :  { %769 = vmatpush3.msra.mxu1 %v405_v39  ;;  %688 = vmatpush3.msra.mxu0 %v372_v41 }
  0x30   :  { %770 = vmatprep.subr.mxu1 %v404_v42  ;;  %689 = vmatprep.subr.mxu0 %v387_v43 }
  0x31   :  { %771 = vmatpush3.msra.mxu1 %v404_v42  ;;  %690 = vmatpush3.msra.mxu0 %v371_v44 }
  0x32   :  { %772 = vmatprep.subr.mxu1 %v403_v45  ;;  %691 = vmatprep.subr.mxu0 %v386_v46 }
  0x33   :  { %773 = vmatpush3.msra.mxu1 %v403_v45  ;;  %692 = vmatpush3.msra.mxu0 %v370_v47 }
  0x34   :  { %774 = vmatprep.subr.mxu1 %v402_v48  ;;  %693 = vmatprep.subr.mxu0 %v385_v49 }
  0x35   :  { %775 = vmatpush3.msra.mxu1 %v402_v48  ;;  %694 = vmatpush3.msra.mxu0 %v369_v50 }
  0x36   :  { %776 = vmatprep.subr.mxu1 %v401_v51  ;;  %695 = vmatprep.subr.mxu0 %v384_v52 }
  0x37   :  { %777 = vmatpush3.msra.mxu1 %v401_v51  ;;  %696 = vmatpush3.msra.mxu0 %v368_v53 }
  0x38   :  { %778 = vmatprep.subr.mxu1 %v400_v54  ;;  %697 = vmatprep.subr.mxu0 %v383_v55 }
  0x39   :  { %779 = vmatpush3.msra.mxu1 %v400_v54  ;;  %698 = vmatpush3.msra.mxu0 %v367_v56 }
  0x3a   :  { %780 = vmatprep.subr.mxu1 %v399_v57 }
  0x3b   :  { %781 = vmatpush3.msra.mxu1 %v399_v57 }
  0xd2   :  { %v743_v58 = vpop.f32.mrf.mxu1 }
  0xd3   :  { %v276_v59 = vrot.slane %v743_v58, 7 }
  0xd4   :  { %v138_v60 = vpop.f32.mrf.mxu0  ;;  %v239_v61 = vpop.f32.mrf.mxu1 }
  0xd5   :  { %v275_v63 = vrot.slane %v239_v61, 7 }
  0xd6   :  { %v140_v1 = vpop.f32.mrf.mxu0  ;;  %v746_v2 = vpop.f32.mrf.mxu1 }
  0xd7   :  { %v292_v3 = vsel %vm274_vm2, 0.0, %v275_v63  ;;  %v318_v4 = vadd.f32 %v927_v62, %v140_v1  ;;  %v277_v5 = vsel %vm274_vm2, %v275_v63, %v276_v59  ;;  %v280_v18 = vrot.slane %v746_v2, 7 }
  0xd8   :  { %v294_v6 = vadd.f32 %v292_v3, %v138_v60  ;;  %v144_v7 = vpop.f32.mrf.mxu0  ;;  %v249_v8 = vpop.f32.mrf.mxu1  ;;  %v657_v3 = vld [vmem:[%s967_s4] ss:$0 sm:$0xff]  ;;  %s845_s4 = smov [#allocation5]  }
  0xd9   :  { %v324_v9 = vmax.f32 %v318_v4, 0.0  ;;  %v295_v10 = vadd.f32 %v277_v5, %v144_v7  ;;  %v278_v11 = vrot.slane %v249_v8, 7  ;;  %s629_s16 = sshll.u32 %s845_s4, 4  ;;  %s630_s16 = int_to_ptr.vmem [resolvable:$true] %s629_s16 }
  0xda   :  { %v306_v12 = vadd.f32 %v927_v62, %v294_v6  ;;  %v146_v13 = vpop.f32.mrf.mxu0  ;;  %v749_v14 = vpop.f32.mrf.mxu1  ;;  %s817_s17 = scalar_lea.vmem %s630_s16, 768  ;;  %p822_p6 = scmp.lt.s32.totalorder %s630_s16, %s630_s16 }
  0xdb   :  { %v349_v15 = vrot.slane %v324_v9, 7  ;;  %v319_v16 = vadd.f32 %v927_v62, %v146_v13  ;;  %782 = vmatprep.mubr.f32.mxu1 %v324_v9  ;;  %v279_v20 = vsel %vm274_vm2, %v276_v59, %v278_v11  ;;  %v307_v21 = vadd.f32 %v927_v62, %v295_v10  ;;  %p818_p5 = scmp.ne.s32.totalorder %s630_s16, %s817_s17  ;;  %p823_p7 = scmp.lt.s32.totalorder %s817_s17, %s817_s17 }
  0xdc   :  { %v312_v17 = vmax.f32 %v306_v12, 0.0  ;;  %v150_v19 = vpop.f32.mrf.mxu0  ;;  %v259_v24 = vpop.f32.mrf.mxu1  ;;  %v281_v30 = vsel %vm274_vm2, %v278_v11, %v280_v18  ;;  %v284_v38 = vrot.slane %v749_v14, 7 }
  0xdd   :  { %v325_v22 = vmax.f32 %v319_v16, 0.0  ;;  %v296_v23 = vadd.f32 %v279_v20, %v150_v19  ;;  %659 = vmatprep.mubr.msk.f32.mxu0 %vm658_vm3, %v349_v15  ;;  %v282_v28 = vrot.slane %v259_v24, 7  ;;  %v313_v31 = vmax.f32 %v307_v21, 0.0  ;;  %p824_p8 = por %p823_p7, %p822_p6 }
  0xde   :  { %v152_v25 = vpop.f32.mrf.mxu0  ;;  %487 = vmatmul.mubr.f32.vlgmr.msra.gmra.mxu0 %v312_v17 }
  0xdf   :  { %v350_v26 = vrot.slane %v325_v22, 7  ;;  %783 = vmatmul.mubr.f32.vlgmr.msra.gmra.mxu1 %v325_v22  ;;  %v308_v32 = vadd.f32 %v927_v62, %v296_v23  ;;  %v283_v41 = vsel %vm274_vm2, %v280_v18, %v282_v28  ;;  %v285_v50 = vsel %vm274_vm2, %v282_v28, %v284_v38  ;;  %p825_p9 = pnand %p824_p8, %p818_p5 }
  0xe0   :  { %v156_v29 = vpop.f32.mrf.mxu0  ;;  %785 = vmatprep.mubr.f32.mxu1 %v844_v0 }
  0xe1   :  { %v297_v33 = vadd.f32 %v281_v30, %v156_v29  ;;  %v351_v34 = vsel %vm274_vm2, %v349_v15, %v350_v26  ;;  %v353_v37 = vsel %vm274_vm2, %v350_v26, %v352_v27  ;;  %v314_v42 = vmax.f32 %v308_v32, 0.0 }
  0xe2   :  { %v158_v35 = vpop.f32.mrf.mxu0  ;;  %491 = vmatprep.mubr.f32.mxu0 %v351_v34 }
  0xe3   :  { %v321_v36 = vadd.f32 %v927_v62, %v158_v35  ;;  %492 = vmatmul.mubr.f32.gmra.mxu0 %v313_v31  ;;  %v309_v39 = vadd.f32 %v927_v62, %v297_v33 }
  0xe4   :  { %v162_v40 = vpop.f32.mrf.mxu0  ;;  %496 = vmatprep.mubr.f32.mxu0 %v353_v37 }
  0xe5   :  { %v327_v43 = vmax.f32 %v321_v36, 0.0  ;;  %v298_v44 = vadd.f32 %v283_v41, %v162_v40  ;;  %v315_v48 = vmax.f32 %v309_v39, 0.0 }
  0xe6   :  { %v164_v45 = vpop.f32.mrf.mxu0 }
  0xe7   :  { %v354_v46 = vrot.slane %v327_v43, 7  ;;  %v322_v47 = vadd.f32 %v927_v62, %v164_v45  ;;  %497 = vmatmul.mubr.f32.gmra.mxu0 %v314_v42  ;;  %786 = vmatmul.mubr.f32.gmra.mxu1 %v327_v43  ;;  %v310_v51 = vadd.f32 %v927_v62, %v298_v44 }
  0xe8   :  { %v168_v49 = vpop.f32.mrf.mxu0 }
  0xe9   :  { %v328_v52 = vmax.f32 %v322_v47, 0.0  ;;  %v299_v53 = vadd.f32 %v285_v50, %v168_v49  ;;  %v355_v54 = vsel %vm274_vm2, %v352_v27, %v354_v46  ;;  %v316_v57 = vmax.f32 %v310_v51, 0.0 }
  0xea   :  { %501 = vmatprep.mubr.f32.mxu0 %v355_v54  ;;  %v170_v55 = vpop.f32.mrf.mxu0 }
  0xeb   :  { %v356_v56 = vrot.slane %v328_v52, 7  ;;  %502 = vmatmul.mubr.f32.gmra.mxu0 %v315_v48  ;;  %788 = vmatprep.mubr.f32.mxu1 %v328_v52  ;;  %v311_v58 = vadd.f32 %v927_v62, %v299_v53 }
  0xec   :  { %789 = vmatmul.mubr.f32.gmra.mxu1 %v844_v0 }
  0xed   :  { %v357_v59 = vsel %vm274_vm2, %v354_v46, %v356_v56  ;;  %v359_v60 = vsel %vm274_vm2, %v356_v56, %v352_v27  ;;  %v317_v61 = vmax.f32 %v311_v58, 0.0 }
  0xee   :  { %506 = vmatprep.mubr.f32.mxu0 %v357_v59 }
  0xef   :  { %507 = vmatmul.mubr.f32.gmra.mxu0 %v316_v57 }
  0xf0   :  { %511 = vmatprep.mubr.f32.mxu0 %v359_v60 }
  0xf3   :  { %512 = vmatmul.mubr.f32.gmra.mxu0 %v317_v61 }
 0x19e   :  { %v699_v63 = vpop.f32.mrf.mxu0 }
 0x19f   :  { %v784_v1 = vpop.f32.mrf.mxu1 }
 0x1a0   :  { %v700_v2 = vpop.f32.mrf.mxu0 }
 0x1a1   :  { %v701_v0 = vadd.f32 %v700_v2, %v699_v63  ;;  %v583_v62 = vpop.f32.mrf.mxu1 }
 0x1a3   :  { %v489_v4 = vadd.f32 %v701_v0, %v657_v3  ;;  %v702_v5 = vpop.f32.mrf.mxu0 }
 0x1a5   :  { %v584_v6 = vadd.f32 %v583_v62, %v489_v4  ;;  %v703_v7 = vpop.f32.mrf.mxu0 }
 0x1a6   :  { %v704_v8 = vadd.f32 %v703_v7, %v702_v5 }
 0x1a7   :  { %v612_v9 = vmax.f32 %v584_v6, 0.0  ;;  %v705_v10 = vpop.f32.mrf.mxu0  ;;  %v787_v12 = vpop.f32.mrf.mxu1 }
 0x1a8   :  { %v494_v11 = vadd.f32 %v704_v8, %v657_v3 }
 0x1a9   :  { %618 = vst [vmem:[#allocation5] sm:$0xff] %v612_v9  ;;  %v706_v13 = vpop.f32.mrf.mxu0  ;;  %v593_v19 = vpop.f32.mrf.mxu1 }
 0x1aa   :  { %v589_v14 = vadd.f32 %v784_v1, %v494_v11  ;;  %v707_v15 = vadd.f32 %v706_v13, %v705_v10 }
 0x1ab   :  { %v708_v16 = vpop.f32.mrf.mxu0 }
 0x1ac   :  { %v613_v17 = vmax.f32 %v589_v14, 0.0  ;;  %v499_v18 = vadd.f32 %v707_v15, %v657_v3  ;;  %v790_v24 = vpop.f32.mrf.mxu1 }
 0x1ad   :  { %v709_v20 = vpop.f32.mrf.mxu0 }
 0x1ae   :  { %619 = vst [vmem:[#allocation5 + $0x8] sm:$0xff] %v613_v17  ;;  %v594_v21 = vadd.f32 %v593_v19, %v499_v18  ;;  %v710_v22 = vadd.f32 %v709_v20, %v708_v16  ;;  %v603_v31 = vpop.f32.mrf.mxu1 }
 0x1af   :  { %v711_v23 = vpop.f32.mrf.mxu0 }
 0x1b0   :  { %v614_v25 = vmax.f32 %v594_v21, 0.0  ;;  %v504_v26 = vadd.f32 %v710_v22, %v657_v3 }
 0x1b1   :  { %v712_v27 = vpop.f32.mrf.mxu0 }
 0x1b2   :  { %620 = vst [vmem:[#allocation5 + $0x10] sm:$0xff] %v614_v25  ;;  %v599_v28 = vadd.f32 %v787_v12, %v504_v26  ;;  %v713_v29 = vadd.f32 %v712_v27, %v711_v23 }
 0x1b3   :  { %v714_v30 = vpop.f32.mrf.mxu0 }
 0x1b4   :  { %v615_v32 = vmax.f32 %v599_v28, 0.0  ;;  %v509_v33 = vadd.f32 %v713_v29, %v657_v3 }
 0x1b5   :  { %v715_v34 = vpop.f32.mrf.mxu0 }
 0x1b6   :  { %621 = vst [vmem:[#allocation5 + $0x18] sm:$0xff] %v615_v32  ;;  %v716_v35 = vadd.f32 %v715_v34, %v714_v30  ;;  %v604_v36 = vadd.f32 %v603_v31, %v509_v33 }
 0x1b8   :  { %v514_v37 = vadd.f32 %v716_v35, %v657_v3  ;;  %v616_v38 = vmax.f32 %v604_v36, 0.0 }
 0x1ba   :  { %v609_v39 = vadd.f32 %v790_v24, %v514_v37  ;;  %622 = vst [vmem:[#allocation5 + $0x20] sm:$0xff] %v616_v38 }
 0x1bc   :  { %v617_v40 = vmax.f32 %v609_v39, 0.0 }
 0x1be   :  { %623 = vst [vmem:[#allocation5 + $0x28] sm:$0xff] %v617_v40 }
 0x1bf   :  { %828 = shalt.err (!%p825_p9)
}
 0x1c0   :  { %635 = dma.vmem_to_hbm [thread:$0]  %s630_s16, 768, %s968_s5, [#allocation4], %s842_s21, %s842_s21, %s843_s22  }
 0x1c1   :  { %839 = dma.done.wait [#allocation4], 768  }
 0x1c2   :  { %840 = vsyncadd [#allocation4], 4294966528 }
 0x1c3   :  { %639 = vsyncpa [#allocation3], 1 }
 0x1c4   :  { %640 = vsyncpa [#allocation4], 1 }

</bundles_post_ra>
